<compile_context>
chip_gen: v7x
topology: tpu7x:2x2x1
jax: 0.10.0
libtpu: 0.0.40
codegen_flags: <defaults>
</compile_context>

<pallas_src>
import math

import jax
import jax.numpy as jnp
import numpy as np
from jax.experimental import pallas as pl
from jax.experimental.pallas import tpu as pltpu

BN_EPS = 1e-5
_INV_SQRT2 = 0.7071067811865476


def _round_up(x, m):
  return ((x + m - 1) // m) * m


def _erf_f32(x):
  # XLA / Eigen f32 rational approximation of erf (mul/add/clamp + one
  # reciprocal).  Matches jax.lax.erf to ~1 ulp in float32.
  x = jnp.clip(x, -4.0, 4.0)
  x2 = x * x
  alpha = (-2.72614225801306e-10, 2.77068142495902e-08, -2.10102402082508e-06,
           -5.69250639462346e-05, -7.34990630326855e-04, -2.95459980854025e-03,
           -1.60960333262415e-02)
  beta = (-1.45660718464996e-05, -2.13374055278905e-04, -1.68282697438203e-03,
          -7.37332916720468e-03, -1.42647390514189e-02)
  p = jnp.full_like(x2, alpha[0])
  for c in alpha[1:]:
    p = p * x2 + c
  q = jnp.full_like(x2, beta[0])
  for c in beta[1:]:
    q = q * x2 + c
  # Divide -> EUP reciprocal (frees VALU issue slots when VALU-bound).
  return x * p * pl.reciprocal(q, approx=False)


def _gelu_exact(x):
  # PyTorch nn.GELU() default (erf-based, not the tanh approximation).
  return 0.5 * x * (1.0 + _erf_f32(x * _INV_SQRT2))


def mlp_adapter_kernel(x_ref,
                       w1_ref, b1_ref, s1_ref, sh1_ref,
                       w2_ref, b2_ref, s2_ref, sh2_ref,
                       o_ref):
  # Linear(in -> hidden) + GELU + folded BatchNorm1d(hidden)  (Dropout = id)
  x = x_ref[...].astype(jnp.bfloat16)
  h = jnp.dot(x, w1_ref[...], preferred_element_type=jnp.float32) + b1_ref[...]
  h = _gelu_exact(h)
  h = h * s1_ref[...] + sh1_ref[...]

  # Linear(hidden -> in) + GELU + folded BatchNorm1d(in)      (Dropout = id)
  y = jnp.dot(h.astype(jnp.bfloat16), w2_ref[...],
              preferred_element_type=jnp.float32) + b2_ref[...]
  y = _gelu_exact(y)
  y = y * s2_ref[...] + sh2_ref[...]

  o_ref[...] = y.astype(o_ref.dtype)


def _pad2(a, rows, cols):
  r, c = a.shape
  return jnp.pad(a, ((0, rows - r), (0, cols - c)))


def mlp_adapter_forward(feat, params, *, batch_tile=None):
  """feat: (N, in_features) float32.  params: dict from init_params()."""
  n, in_f = feat.shape
  hid = params["w1t"].shape[1]

  # Lane-dense padding of the feature dims.
  in_pad = _round_up(in_f, 128)
  hid_pad = _round_up(hid, 128)

  # Batch tile: big enough to amortize per-grid-step overhead, at least 2
  # grid steps when possible (megacore), capped so VMEM stays comfortable.
  if batch_tile is None:
    batch_tile = int(min(512, max(8, _round_up(pl.cdiv(n, 2), 8))))
  n_pad = _round_up(n, batch_tile)
  grid = (pl.cdiv(n_pad, batch_tile),)

  # ---- parameter prep: fold BN, zero-pad, cast weights to bf16 ------------
  def fold_bn(g, bt, rm, rv):
    scale = g * jax.lax.rsqrt(rv + BN_EPS)
    shift = bt - rm * scale
    return scale, shift

  s1, sh1 = fold_bn(params["g1"], params["bt1"], params["rm1"], params["rv1"])
  s2, sh2 = fold_bn(params["g2"], params["bt2"], params["rm2"], params["rv2"])

  w1p = _pad2(params["w1t"], in_pad, hid_pad).astype(jnp.bfloat16)
  w2p = _pad2(params["w2t"], hid_pad, in_pad).astype(jnp.bfloat16)
  b1p = _pad2(params["b1"], 1, hid_pad)
  b2p = _pad2(params["b2"], 1, in_pad)
  s1p = _pad2(s1, 1, hid_pad)
  sh1p = _pad2(sh1, 1, hid_pad)
  s2p = _pad2(s2, 1, in_pad)
  sh2p = _pad2(sh2, 1, in_pad)
  x_pad = _pad2(feat, n_pad, in_pad)

  # ---- specs ---------------------------------------------------------------
  full = lambda r, c: pl.BlockSpec((r, c), lambda i: (0, 0))  # resident block
  in_specs = [
      pl.BlockSpec((batch_tile, in_pad), lambda i: (i, 0)),   # x: batch-tiled
      full(in_pad, hid_pad), full(1, hid_pad),                # w1t, b1
      full(1, hid_pad), full(1, hid_pad),                     # bn1 scale/shift
      full(hid_pad, in_pad), full(1, in_pad),                 # w2t, b2
      full(1, in_pad), full(1, in_pad),                       # bn2 scale/shift
  ]
  out_spec = pl.BlockSpec((batch_tile, in_pad), lambda i: (i, 0))

  # ---- cost hint + VMEM budget --------------------------------------------
  flops = 2 * n_pad * (in_pad * hid_pad + hid_pad * in_pad)
  transcendentals = n_pad * (hid_pad + in_pad)          # one recip per GELU elt
  bytes_accessed = (n_pad * in_pad * 4 * 2              # x in + out (f32)
                    + 2 * in_pad * hid_pad * 2          # two bf16 weight mats
                    + (3 * hid_pad + 3 * in_pad) * 4)   # bias / scale / shift
  cost = pl.CostEstimate(flops=flops, transcendentals=transcendentals,
                         bytes_accessed=bytes_accessed)

  weight_bytes = 2 * (in_pad * hid_pad * 2)             # bf16 weights
  vec_bytes = (3 * hid_pad + 3 * in_pad) * 4
  act_bytes = 2 * 2 * batch_tile * in_pad * 4           # x + out, 2x buffered
  scratch_bytes = 4 * batch_tile * hid_pad * 4          # intermediates headroom
  est_vmem = 2 * (weight_bytes + vec_bytes) + act_bytes + scratch_bytes
  vmem_limit = None
  if est_vmem > 12 * 1024 * 1024:                       # above v5e scoped default
    vmem_limit = int(min(est_vmem * 3 // 2, 48 * 1024 * 1024))

  out = pl.pallas_call(
      mlp_adapter_kernel,
      out_shape=jax.ShapeDtypeStruct((n_pad, in_pad), feat.dtype),
      grid=grid,
      in_specs=in_specs,
      out_specs=out_spec,
      compiler_params=pltpu.CompilerParams(
          dimension_semantics=("parallel",),
          vmem_limit_bytes=vmem_limit),
      cost_estimate=cost,
  )(x_pad, w1p, b1p, s1p, sh1p, w2p, b2p, s2p, sh2p)

  return out[:n, :in_f]


def init_params(key, in_features, hidden_features, dtype=jnp.float32):
  """Deterministic init mirroring MLP._initialize_weights / nn.BatchNorm1d."""
  k1, k2 = jax.random.split(key)
  # kaiming_normal_(mode='fan_out', nonlinearity='relu'): std = sqrt(2/fan_out)
  w1 = jax.random.normal(k1, (hidden_features, in_features), dtype) * math.sqrt(
      2.0 / hidden_features)
  w2 = jax.random.normal(k2, (in_features, hidden_features), dtype) * math.sqrt(
      2.0 / in_features)
  ones = lambda c: jnp.ones((1, c), dtype)
  zeros = lambda c: jnp.zeros((1, c), dtype)
  return {
      "w1t": w1.T, "b1": zeros(hidden_features),
      "g1": ones(hidden_features), "bt1": zeros(hidden_features),
      "rm1": zeros(hidden_features), "rv1": ones(hidden_features),
      "w2t": w2.T, "b2": zeros(in_features),
      "g2": ones(in_features), "bt2": zeros(in_features),
      "rm2": zeros(in_features), "rv2": ones(in_features),
  }


def _reference_forward(feat, p):
  """Pure-JAX eval-mode reference matching the kernel's bf16 matmul inputs."""
  bf = lambda a: a.astype(jnp.bfloat16)
  gelu = lambda v: 0.5 * v * (1.0 + jax.scipy.special.erf(v * _INV_SQRT2))
  bn = lambda v, g, b, m, s: (v - m) * jax.lax.rsqrt(s + BN_EPS) * g + b
  h = jnp.dot(bf(feat), bf(p["w1t"]),
              preferred_element_type=jnp.float32) + p["b1"]
  h = bn(gelu(h), p["g1"], p["bt1"], p["rm1"], p["rv1"])
  y = jnp.dot(bf(h), bf(p["w2t"]),
              preferred_element_type=jnp.float32) + p["b2"]
  y = bn(gelu(y), p["g2"], p["bt2"], p["rm2"], p["rv2"])
  return y


if __name__ == "__main__":
  N, IN_FEATURES, HIDDEN_FEATURES = 16, 32, 64
  key = jax.random.PRNGKey(0)
  k_param, k_x = jax.random.split(key)

  params = init_params(k_param, IN_FEATURES, HIDDEN_FEATURES, jnp.float32)
  feat = jax.random.normal(k_x, (N, IN_FEATURES), jnp.float32)

  out = mlp_adapter_forward(feat, params)
  out = jax.block_until_ready(out)

  ref = _reference_forward(feat, params)
  assert out.shape == (N, IN_FEATURES) and out.dtype == jnp.float32
  np.testing.assert_allclose(np.asarray(out), np.asarray(ref),
                             rtol=2e-3, atol=2e-3)
  print("KERNEL_OK")
</pallas_src>

<mosaic_0001>
module attributes {stable_mosaic.version = 11 : i64} {
  func.func @mlp_adapter_kernel(%arg0: i32, %arg1: memref<8x128xf32, #tpu.memory_space<vmem>>, %arg2: memref<128x128xbf16, #tpu.memory_space<vmem>>, %arg3: memref<1x128xf32, #tpu.memory_space<vmem>>, %arg4: memref<1x128xf32, #tpu.memory_space<vmem>>, %arg5: memref<1x128xf32, #tpu.memory_space<vmem>>, %arg6: memref<128x128xbf16, #tpu.memory_space<vmem>>, %arg7: memref<1x128xf32, #tpu.memory_space<vmem>>, %arg8: memref<1x128xf32, #tpu.memory_space<vmem>>, %arg9: memref<1x128xf32, #tpu.memory_space<vmem>>, %arg10: memref<8x128xf32, #tpu.memory_space<vmem>>) attributes {dimension_semantics = [#tpu.dimension_semantics<parallel>], iteration_bounds = array<i64: 2>, scalar_prefetch = 0 : i64, scratch_operands = 0 : i64, tpu.core_type = #tpu.core_type<tc>, window_params = [{transform_indices = @transform_0, window_bounds = array<i64: 8, 128>}, {pipeline_mode = #tpu.pipeline_mode<synchronous>, transform_indices = @transform_1, window_bounds = array<i64: 128, 128>}, {pipeline_mode = #tpu.pipeline_mode<synchronous>, transform_indices = @transform_2, window_bounds = array<i64: 1, 128>}, {pipeline_mode = #tpu.pipeline_mode<synchronous>, transform_indices = @transform_3, window_bounds = array<i64: 1, 128>}, {pipeline_mode = #tpu.pipeline_mode<synchronous>, transform_indices = @transform_4, window_bounds = array<i64: 1, 128>}, {pipeline_mode = #tpu.pipeline_mode<synchronous>, transform_indices = @transform_5, window_bounds = array<i64: 128, 128>}, {pipeline_mode = #tpu.pipeline_mode<synchronous>, transform_indices = @transform_6, window_bounds = array<i64: 1, 128>}, {pipeline_mode = #tpu.pipeline_mode<synchronous>, transform_indices = @transform_7, window_bounds = array<i64: 1, 128>}, {pipeline_mode = #tpu.pipeline_mode<synchronous>, transform_indices = @transform_8, window_bounds = array<i64: 1, 128>}, {transform_indices = @transform_9, window_bounds = array<i64: 8, 128>}]} {
    %c0 = arith.constant 0 : index
    %c0_0 = arith.constant 0 : index
    %0 = vector.load %arg1[%c0, %c0_0] : memref<8x128xf32, #tpu.memory_space<vmem>>, vector<8x128xf32>
    %1 = arith.truncf %0 : vector<8x128xf32> to vector<8x128xbf16>
    %c0_1 = arith.constant 0 : index
    %c0_2 = arith.constant 0 : index
    %2 = vector.load %arg2[%c0_1, %c0_2] : memref<128x128xbf16, #tpu.memory_space<vmem>>, vector<128x128xbf16>
    %cst = arith.constant dense<0.000000e+00> : vector<8x128xf32>
    %3 = tpu.matmul %1, %2, %cst {dimension_numbers = #tpu.dot_dimension_numbers<[1], [0], [0], [1], [0, 0, 1, 1], [], []>} : vector<8x128xbf16>, vector<128x128xbf16>, vector<8x128xf32> -> vector<8x128xf32>
    %c0_3 = arith.constant 0 : index
    %c0_4 = arith.constant 0 : index
    %4 = vector.load %arg3[%c0_3, %c0_4] : memref<1x128xf32, #tpu.memory_space<vmem>>, vector<1x128xf32>
    %5 = vector.broadcast %4 : vector<1x128xf32> to vector<8x128xf32>
    %6 = arith.addf %3, %5 : vector<8x128xf32>
    %cst_5 = arith.constant 5.000000e-01 : f32
    %7 = vector.broadcast %cst_5 : f32 to vector<8x128xf32>
    %8 = arith.mulf %7, %6 : vector<8x128xf32>
    %cst_6 = arith.constant 0.707106769 : f32
    %9 = vector.broadcast %cst_6 : f32 to vector<8x128xf32>
    %10 = arith.mulf %6, %9 : vector<8x128xf32>
    %cst_7 = arith.constant -4.000000e+00 : f32
    %cst_8 = arith.constant 4.000000e+00 : f32
    %11 = vector.broadcast %cst_7 : f32 to vector<8x128xf32>
    %12 = arith.maximumf %11, %10 : vector<8x128xf32>
    %13 = vector.broadcast %cst_8 : f32 to vector<8x128xf32>
    %14 = arith.minimumf %13, %12 : vector<8x128xf32>
    %15 = arith.mulf %14, %14 : vector<8x128xf32>
    %cst_9 = arith.constant -2.72614237E-10 : f32
    %16 = vector.broadcast %cst_9 : f32 to vector<8x128xf32>
    %17 = arith.mulf %16, %15 : vector<8x128xf32>
    %cst_10 = arith.constant 2.77068146E-8 : f32
    %18 = vector.broadcast %cst_10 : f32 to vector<8x128xf32>
    %19 = arith.addf %17, %18 : vector<8x128xf32>
    %20 = arith.mulf %19, %15 : vector<8x128xf32>
    %cst_11 = arith.constant -2.10102394E-6 : f32
    %21 = vector.broadcast %cst_11 : f32 to vector<8x128xf32>
    %22 = arith.addf %20, %21 : vector<8x128xf32>
    %23 = arith.mulf %22, %15 : vector<8x128xf32>
    %cst_12 = arith.constant -5.69250624E-5 : f32
    %24 = vector.broadcast %cst_12 : f32 to vector<8x128xf32>
    %25 = arith.addf %23, %24 : vector<8x128xf32>
    %26 = arith.mulf %25, %15 : vector<8x128xf32>
    %cst_13 = arith.constant -7.34990637E-4 : f32
    %27 = vector.broadcast %cst_13 : f32 to vector<8x128xf32>
    %28 = arith.addf %26, %27 : vector<8x128xf32>
    %29 = arith.mulf %28, %15 : vector<8x128xf32>
    %cst_14 = arith.constant -2.954600e-03 : f32
    %30 = vector.broadcast %cst_14 : f32 to vector<8x128xf32>
    %31 = arith.addf %29, %30 : vector<8x128xf32>
    %32 = arith.mulf %31, %15 : vector<8x128xf32>
    %cst_15 = arith.constant -0.0160960332 : f32
    %33 = vector.broadcast %cst_15 : f32 to vector<8x128xf32>
    %34 = arith.addf %32, %33 : vector<8x128xf32>
    %cst_16 = arith.constant -1.45660715E-5 : f32
    %35 = vector.broadcast %cst_16 : f32 to vector<8x128xf32>
    %36 = arith.mulf %35, %15 : vector<8x128xf32>
    %cst_17 = arith.constant -2.13374049E-4 : f32
    %37 = vector.broadcast %cst_17 : f32 to vector<8x128xf32>
    %38 = arith.addf %36, %37 : vector<8x128xf32>
    %39 = arith.mulf %38, %15 : vector<8x128xf32>
    %cst_18 = arith.constant -0.00168282702 : f32
    %40 = vector.broadcast %cst_18 : f32 to vector<8x128xf32>
    %41 = arith.addf %39, %40 : vector<8x128xf32>
    %42 = arith.mulf %41, %15 : vector<8x128xf32>
    %cst_19 = arith.constant -0.00737332925 : f32
    %43 = vector.broadcast %cst_19 : f32 to vector<8x128xf32>
    %44 = arith.addf %42, %43 : vector<8x128xf32>
    %45 = arith.mulf %44, %15 : vector<8x128xf32>
    %cst_20 = arith.constant -0.0142647391 : f32
    %46 = vector.broadcast %cst_20 : f32 to vector<8x128xf32>
    %47 = arith.addf %45, %46 : vector<8x128xf32>
    %48 = arith.mulf %14, %34 : vector<8x128xf32>
    %49 = tpu.reciprocal %47 : vector<8x128xf32> -> vector<8x128xf32>
    %50 = arith.mulf %48, %49 : vector<8x128xf32>
    %cst_21 = arith.constant 1.000000e+00 : f32
    %51 = vector.broadcast %cst_21 : f32 to vector<8x128xf32>
    %52 = arith.addf %51, %50 : vector<8x128xf32>
    %53 = arith.mulf %8, %52 : vector<8x128xf32>
    %c0_22 = arith.constant 0 : index
    %c0_23 = arith.constant 0 : index
    %54 = vector.load %arg4[%c0_22, %c0_23] : memref<1x128xf32, #tpu.memory_space<vmem>>, vector<1x128xf32>
    %55 = vector.broadcast %54 : vector<1x128xf32> to vector<8x128xf32>
    %56 = arith.mulf %53, %55 : vector<8x128xf32>
    %c0_24 = arith.constant 0 : index
    %c0_25 = arith.constant 0 : index
    %57 = vector.load %arg5[%c0_24, %c0_25] : memref<1x128xf32, #tpu.memory_space<vmem>>, vector<1x128xf32>
    %58 = vector.broadcast %57 : vector<1x128xf32> to vector<8x128xf32>
    %59 = arith.addf %56, %58 : vector<8x128xf32>
    %60 = arith.truncf %59 : vector<8x128xf32> to vector<8x128xbf16>
    %c0_26 = arith.constant 0 : index
    %c0_27 = arith.constant 0 : index
    %61 = vector.load %arg6[%c0_26, %c0_27] : memref<128x128xbf16, #tpu.memory_space<vmem>>, vector<128x128xbf16>
    %cst_28 = arith.constant dense<0.000000e+00> : vector<8x128xf32>
    %62 = tpu.matmul %60, %61, %cst_28 {dimension_numbers = #tpu.dot_dimension_numbers<[1], [0], [0], [1], [0, 0, 1, 1], [], []>} : vector<8x128xbf16>, vector<128x128xbf16>, vector<8x128xf32> -> vector<8x128xf32>
    %c0_29 = arith.constant 0 : index
    %c0_30 = arith.constant 0 : index
    %63 = vector.load %arg7[%c0_29, %c0_30] : memref<1x128xf32, #tpu.memory_space<vmem>>, vector<1x128xf32>
    %64 = vector.broadcast %63 : vector<1x128xf32> to vector<8x128xf32>
    %65 = arith.addf %62, %64 : vector<8x128xf32>
    %cst_31 = arith.constant 5.000000e-01 : f32
    %66 = vector.broadcast %cst_31 : f32 to vector<8x128xf32>
    %67 = arith.mulf %66, %65 : vector<8x128xf32>
    %cst_32 = arith.constant 0.707106769 : f32
    %68 = vector.broadcast %cst_32 : f32 to vector<8x128xf32>
    %69 = arith.mulf %65, %68 : vector<8x128xf32>
    %cst_33 = arith.constant -4.000000e+00 : f32
    %cst_34 = arith.constant 4.000000e+00 : f32
    %70 = vector.broadcast %cst_33 : f32 to vector<8x128xf32>
    %71 = arith.maximumf %70, %69 : vector<8x128xf32>
    %72 = vector.broadcast %cst_34 : f32 to vector<8x128xf32>
    %73 = arith.minimumf %72, %71 : vector<8x128xf32>
    %74 = arith.mulf %73, %73 : vector<8x128xf32>
    %cst_35 = arith.constant -2.72614237E-10 : f32
    %75 = vector.broadcast %cst_35 : f32 to vector<8x128xf32>
    %76 = arith.mulf %75, %74 : vector<8x128xf32>
    %cst_36 = arith.constant 2.77068146E-8 : f32
    %77 = vector.broadcast %cst_36 : f32 to vector<8x128xf32>
    %78 = arith.addf %76, %77 : vector<8x128xf32>
    %79 = arith.mulf %78, %74 : vector<8x128xf32>
    %cst_37 = arith.constant -2.10102394E-6 : f32
    %80 = vector.broadcast %cst_37 : f32 to vector<8x128xf32>
    %81 = arith.addf %79, %80 : vector<8x128xf32>
    %82 = arith.mulf %81, %74 : vector<8x128xf32>
    %cst_38 = arith.constant -5.69250624E-5 : f32
    %83 = vector.broadcast %cst_38 : f32 to vector<8x128xf32>
    %84 = arith.addf %82, %83 : vector<8x128xf32>
    %85 = arith.mulf %84, %74 : vector<8x128xf32>
    %cst_39 = arith.constant -7.34990637E-4 : f32
    %86 = vector.broadcast %cst_39 : f32 to vector<8x128xf32>
    %87 = arith.addf %85, %86 : vector<8x128xf32>
    %88 = arith.mulf %87, %74 : vector<8x128xf32>
    %cst_40 = arith.constant -2.954600e-03 : f32
    %89 = vector.broadcast %cst_40 : f32 to vector<8x128xf32>
    %90 = arith.addf %88, %89 : vector<8x128xf32>
    %91 = arith.mulf %90, %74 : vector<8x128xf32>
    %cst_41 = arith.constant -0.0160960332 : f32
    %92 = vector.broadcast %cst_41 : f32 to vector<8x128xf32>
    %93 = arith.addf %91, %92 : vector<8x128xf32>
    %cst_42 = arith.constant -1.45660715E-5 : f32
    %94 = vector.broadcast %cst_42 : f32 to vector<8x128xf32>
    %95 = arith.mulf %94, %74 : vector<8x128xf32>
    %cst_43 = arith.constant -2.13374049E-4 : f32
    %96 = vector.broadcast %cst_43 : f32 to vector<8x128xf32>
    %97 = arith.addf %95, %96 : vector<8x128xf32>
    %98 = arith.mulf %97, %74 : vector<8x128xf32>
    %cst_44 = arith.constant -0.00168282702 : f32
    %99 = vector.broadcast %cst_44 : f32 to vector<8x128xf32>
    %100 = arith.addf %98, %99 : vector<8x128xf32>
    %101 = arith.mulf %100, %74 : vector<8x128xf32>
    %cst_45 = arith.constant -0.00737332925 : f32
    %102 = vector.broadcast %cst_45 : f32 to vector<8x128xf32>
    %103 = arith.addf %101, %102 : vector<8x128xf32>
    %104 = arith.mulf %103, %74 : vector<8x128xf32>
    %cst_46 = arith.constant -0.0142647391 : f32
    %105 = vector.broadcast %cst_46 : f32 to vector<8x128xf32>
    %106 = arith.addf %104, %105 : vector<8x128xf32>
    %107 = arith.mulf %73, %93 : vector<8x128xf32>
    %108 = tpu.reciprocal %106 : vector<8x128xf32> -> vector<8x128xf32>
    %109 = arith.mulf %107, %108 : vector<8x128xf32>
    %cst_47 = arith.constant 1.000000e+00 : f32
    %110 = vector.broadcast %cst_47 : f32 to vector<8x128xf32>
    %111 = arith.addf %110, %109 : vector<8x128xf32>
    %112 = arith.mulf %67, %111 : vector<8x128xf32>
    %c0_48 = arith.constant 0 : index
    %c0_49 = arith.constant 0 : index
    %113 = vector.load %arg8[%c0_48, %c0_49] : memref<1x128xf32, #tpu.memory_space<vmem>>, vector<1x128xf32>
    %114 = vector.broadcast %113 : vector<1x128xf32> to vector<8x128xf32>
    %115 = arith.mulf %112, %114 : vector<8x128xf32>
    %c0_50 = arith.constant 0 : index
    %c0_51 = arith.constant 0 : index
    %116 = vector.load %arg9[%c0_50, %c0_51] : memref<1x128xf32, #tpu.memory_space<vmem>>, vector<1x128xf32>
    %117 = vector.broadcast %116 : vector<1x128xf32> to vector<8x128xf32>
    %118 = arith.addf %115, %117 : vector<8x128xf32>
    %c0_52 = arith.constant 0 : index
    %c0_53 = arith.constant 0 : index
    %119 = vector.load %arg10[%c0_52, %c0_53] : memref<8x128xf32, #tpu.memory_space<vmem>>, vector<8x128xf32>
    tpu.vector_store %arg10[%c0_52, %c0_53], %118 {strides = array<i32>} : memref<8x128xf32, #tpu.memory_space<vmem>>, vector<8x128xf32>,
    return
  }
  func.func @transform_0(%arg0: i32) -> (i32, i32) {
    %c0_i32 = arith.constant 0 : i32
    %c0_i32_0 = arith.constant 0 : i32
    return %arg0, %c0_i32 : i32, i32
  }
  func.func @transform_1(%arg0: i32) -> (i32, i32) {
    %c0_i32 = arith.constant 0 : i32
    %c0_i32_0 = arith.constant 0 : i32
    %c0_i32_1 = arith.constant 0 : i32
    return %c0_i32, %c0_i32_0 : i32, i32
  }
  func.func @transform_2(%arg0: i32) -> (i32, i32) {
    %c0_i32 = arith.constant 0 : i32
    %c0_i32_0 = arith.constant 0 : i32
    %c0_i32_1 = arith.constant 0 : i32
    return %c0_i32, %c0_i32_0 : i32, i32
  }
  func.func @transform_3(%arg0: i32) -> (i32, i32) {
    %c0_i32 = arith.constant 0 : i32
    %c0_i32_0 = arith.constant 0 : i32
    %c0_i32_1 = arith.constant 0 : i32
    return %c0_i32, %c0_i32_0 : i32, i32
  }
  func.func @transform_4(%arg0: i32) -> (i32, i32) {
    %c0_i32 = arith.constant 0 : i32
    %c0_i32_0 = arith.constant 0 : i32
    %c0_i32_1 = arith.constant 0 : i32
    return %c0_i32, %c0_i32_0 : i32, i32
  }
  func.func @transform_5(%arg0: i32) -> (i32, i32) {
    %c0_i32 = arith.constant 0 : i32
    %c0_i32_0 = arith.constant 0 : i32
    %c0_i32_1 = arith.constant 0 : i32
    return %c0_i32, %c0_i32_0 : i32, i32
  }
  func.func @transform_6(%arg0: i32) -> (i32, i32) {
    %c0_i32 = arith.constant 0 : i32
    %c0_i32_0 = arith.constant 0 : i32
    %c0_i32_1 = arith.constant 0 : i32
    return %c0_i32, %c0_i32_0 : i32, i32
  }
  func.func @transform_7(%arg0: i32) -> (i32, i32) {
    %c0_i32 = arith.constant 0 : i32
    %c0_i32_0 = arith.constant 0 : i32
    %c0_i32_1 = arith.constant 0 : i32
    return %c0_i32, %c0_i32_0 : i32, i32
  }
  func.func @transform_8(%arg0: i32) -> (i32, i32) {
    %c0_i32 = arith.constant 0 : i32
    %c0_i32_0 = arith.constant 0 : i32
    %c0_i32_1 = arith.constant 0 : i32
    return %c0_i32, %c0_i32_0 : i32, i32
  }
  func.func @transform_9(%arg0: i32) -> (i32, i32) {
    %c0_i32 = arith.constant 0 : i32
    %c0_i32_0 = arith.constant 0 : i32
    return %arg0, %c0_i32 : i32, i32
  }
}

</mosaic_0001>

<bundles_post_ra>
// kernel: tpu_custom_call.1
= control target key start
LH: loop header
LB: loop body
LE: loop exit
PB: predicated region body
PF: predicated region fallthrough
CT: control target
= control target key end

     0   :  { %14 = vsyncpa [#allocation3], 0  ;;  %s1458_s0 = inlined_call_operand.hbm [shape: f32[16,128], index: 0, kind: input, shape index: {}]   ;;  %s1459_s1 = inlined_call_operand.hbm [shape: bf16[128,128], index: 1, kind: input, shape index: {}]   ;;  %s1460_s2 = inlined_call_operand.vmem [shape: f32[1,128], index: 2, kind: input, shape index: {}]   ;;  %s1461_s3 = inlined_call_operand.vmem [shape: f32[1,128], index: 3, kind: input, shape index: {}]   ;;  %s1462_s4 = inlined_call_operand.vmem [shape: f32[1,128], index: 4, kind: input, shape index: {}]   ;;  %s1463_s5 = inlined_call_operand.hbm [shape: bf16[128,128], index: 5, kind: input, shape index: {}]   ;;  %s1464_s6 = inlined_call_operand.vmem [shape: f32[1,128], index: 6, kind: input, shape index: {}]   ;;  %s1465_s7 = inlined_call_operand.vmem [shape: f32[1,128], index: 7, kind: input, shape index: {}]   ;;  %s1466_s8 = inlined_call_operand.vmem [shape: f32[1,128], index: 8, kind: input, shape index: {}]   ;;  %s1467_s9 = inlined_call_operand.hbm [shape: f32[16,128], index: 9, kind: output, shape index: {}]  }
   0x1   :  { %16 = vsyncpa [#allocation3 + $0x1], 0 }
   0x2   :  { %17 = vsyncpa [#allocation6], 0 }
   0x3   :  { %18 = vsyncpa [#allocation4], 0 }
   0x4   :  { %20 = vsyncpa [#allocation4 + $0x1], 0  ;;  %s1204_s30 = smov 0   ;;  %s1206_s10 = smov 0  }
   0x5   :  { %s1208_s11 = smov 0   ;;  %s1210_s12 = smov 0  }
   0x6 LB: > { %s1225_s13 = sadd.s32 4294967295, %s1144_s12   ;;  %s799_s14 = sadd.s32 4294967294, %s1144_s12   ;;  %s1144_s12 = sphi %s1210_s12, %s1490_s12   ;;  %s1140_s11 = sphi %s1208_s11, %s1489_s11   ;;  %s1136_s10 = sphi %s1206_s10, %s1488_s10   ;;  %s1132_s30 = sphi %s1204_s30, %s1487_s30  }
   0x7   : > { %p46_p0 = scmp.ne.s32.totalorder %s1136_s10, %s1132_s30  ;;  %p1468_p1 = scmp.eq.s32.totalorder %s1225_s13, 0 }
   0x8   : > { %p244_p3 = scmp.eq.s32.totalorder %s799_s14, 1  ;;  %p800_p5 = scmp.ge.s32.totalorder %s1144_s12, 1 }
   0x9   : > { %p1234_p4 = por %p1468_p1, %p46_p0  ;;  %p251_p7 = scmp.lt.s32.totalorder %s1144_s12, 3 }
   0xa   : > { %p1239_p6 = por %p244_p3, %p46_p0  ;;  %s1146_s18 = smov [#allocation5]  }
   0xb   : > { %s1472_s15 = scalar_select %p1234_p4, 1, 0 }
   0xc   : > { %s1473_s16 = scalar_select %p1239_p6, 1, 0 }
   0xd   : > { %p1244_p8 = pnand %p800_p5, %p251_p7  ;;  %s263_s19 = sshll.u32 %s1146_s18, 4  ;;  %s1248_s19 = int_to_ptr.vmem [resolvable:$true] %s263_s19 }
   0xe   : > { %1474 = sst [smem:[#allocation12_spill]] %s1473_s16  ;;  %s1147_s21 = smov [#allocation7]  }
   0xf   : > { %p909_p9 = pneg %p1244_p8  ;;  %s285_s22 = sshll.u32 %s1147_s21, 4  ;;  %s1259_s22 = int_to_ptr.vmem [resolvable:$true] %s285_s22 }
  0x10   : > { %s988_s25 = scalar_lea.hbm %s1459_s1, 1024 }
  0x11   : > { %p1255_p11 = pnand %p909_p9, %p1468_p1  ;;  %p989_p12 = scmp.ne.s32.totalorder %s1459_s1, %s988_s25 }
  0x12   : > { %p995_p5 = scmp.lt.u32.totalorder %s988_s25, %s1459_s1 }
  0x13   : > { %p990_p13 = pneg %p1255_p11 }
  0x15   : > { %p991_p0 = pnand %p990_p13, %p989_p12 }
  0x17   : > { %p992_p3 = pneg %p991_p0 }
  0x19   : > { %p997_p7 = pnand %p995_p5, %p992_p3 }
  0x1b   : > { %1000 = shalt.err (!%p997_p7)
}
  0x1c   : > { %s1001_s14 = scalar_lea.vmem %s1248_s19, 1024  ;;  %p1009_p2 = scmp.lt.s32.totalorder %s1248_s19, %s1248_s19 }
  0x1d   : > { %p1002_p9 = scmp.ne.s32.totalorder %s1248_s19, %s1001_s14  ;;  %p1010_p12 = scmp.lt.s32.totalorder %s1001_s14, %s1001_s14 }
  0x1f   : > { %p1004_p10 = pnand %p1002_p9, %p990_p13  ;;  %p1011_p0 = por %p1010_p12, %p1009_p2 }
  0x21   : > { %p1005_p1 = pneg %p1004_p10 }
  0x23   : > { %p1012_p6 = pnand %p1011_p0, %p1005_p1 }
  0x25   : > { %1015 = shalt.err (!%p1012_p6)
}
  0x26   : > { %s1148_s18 = smov 64   ;;  %s1149_s21 = smov 4  }
  0x27   : > { %912 = dma.hbm_to_vmem [thread:$0]  (!%p1255_p11), %s1459_s1, 1024, %s1248_s19, [#allocation6], %s1148_s18, %s1148_s18, %s1149_s21  }
  0x28   : > { %s1016_s27 = scalar_lea.hbm %s1463_s5, 1024 }
  0x29   : > { %p1017_p2 = scmp.ne.s32.totalorder %s1463_s5, %s1016_s27  ;;  %p1023_p10 = scmp.lt.u32.totalorder %s1016_s27, %s1463_s5 }
  0x2b   : > { %p1019_p1 = pnand %p1017_p2, %p990_p13 }
  0x2d   : > { %p1020_p6 = pneg %p1019_p1 }
  0x2f   : > { %p1025_p3 = pnand %p1023_p10, %p1020_p6 }
  0x31   : > { %1028 = shalt.err (!%p1025_p3)
}
  0x32   : > { %s1029_s19 = scalar_lea.vmem %s1259_s22, 1024  ;;  %p1037_p12 = scmp.lt.s32.totalorder %s1259_s22, %s1259_s22 }
  0x33   : > { %p1030_p5 = scmp.ne.s32.totalorder %s1259_s22, %s1029_s19  ;;  %p1038_p0 = scmp.lt.s32.totalorder %s1029_s19, %s1029_s19 }
  0x35   : > { %p1032_p7 = pnand %p1030_p5, %p990_p13  ;;  %p1039_p2 = por %p1038_p0, %p1037_p12 }
  0x37   : > { %p1033_p9 = pneg %p1032_p7 }
  0x39   : > { %p1040_p1 = pnand %p1039_p2, %p1033_p9 }
  0x3b   : > { %1043 = shalt.err (!%p1040_p1)
}
  0x3c   : > { %915 = dma.hbm_to_vmem [thread:$0]  (!%p1255_p11), %s1463_s5, 1024, %s1259_s22, [#allocation6], %s1148_s18, %s1148_s18, %s1149_s21  }
  0x3d   : > { %s1314_s24 = sadd.s32 1, %s1144_s12   ;;  %s33_s20 = sadd.s32 1, %s1140_s11 }
  0x3e   : > { %s30_s25 = ssub.s32 %s1144_s12, %s1314_s24  ;;  %p40_p13 = scmp.ne.s32.totalorder %s1140_s11, %s1136_s10 }
  0x3f   : > { %p31_p6 = scmp.eq.s32.totalorder %s30_s25, 0  ;;  %p41_p10 = scmp.eq.s32.totalorder %s1144_s12, 0 }
  0x40   : > { %p1477_p3 = scmp.eq.s32.totalorder %s1225_s13, 1  ;;  %p926_p7 = scmp.lt.s32.totalorder %s1144_s12, 2 }
  0x41   : > { %s1330_s27 = scalar_select %p31_p6, %s1140_s11, %s33_s20  }
  0x42   : > { %p1324_p5 = por %p1477_p3, %p40_p13  ;;  %p42_p9 = por %p41_p10, %p40_p13 }
  0x43   : > { %s308_s28 = sand.u32 1, %s1140_s11   ;;  %s805_s22 = sshll.u32 %s1144_s12, 7 }
  0x44   : > { %s1478_s26 = scalar_select %p1324_p5, 1, 0 }
  0x45   : > { %s804_s29 = sshll.u32 %s308_s28, 3  ;;  %s1337_s14 = scalar_lea.hbm %s1458_s0, %s805_s22 }
  0x46   : > { %s312_s19 = scalar_lea.vmem [#allocation2], %s804_s29  ;;  %p1341_p11 = pnand %p926_p7, %p42_p9 }
  0x47   : > { %s319_s16 = sshll.u32 %s312_s19, 4  ;;  %s309_s20 = scalar_lea.sflag [#allocation3], %s308_s28  ;;  %s1339_s16 = int_to_ptr.vmem [resolvable:$true] %s319_s16 }
  0x48   : > { %s1044_s25 = scalar_lea.hbm %s1337_s14, 128  ;;  %p1046_p0 = pneg %p1341_p11 }
  0x49   : > { %p1045_p12 = scmp.ne.s32.totalorder %s1337_s14, %s1044_s25  ;;  %s1049_s18 = scalar_lea.hbm %s1458_s0, 256 }
  0x4a   : > { %p1050_p13 = scmp.lt.u32.totalorder %s1337_s14, %s1458_s0  ;;  %p1051_p6 = scmp.lt.u32.totalorder %s1049_s18, %s1044_s25 }
  0x4b   : > { %p1047_p2 = pnand %p1046_p0, %p1045_p12  ;;  %p1053_p3 = scmp.lt.u32.totalorder %s1044_s25, %s1337_s14 }
  0x4c   : > { %p1052_p10 = por %p1051_p6, %p1050_p13 }
  0x4d   : > { %p1048_p1 = pneg %p1047_p2 }
  0x4e   : > { %p1054_p7 = por %p1053_p3, %p1052_p10 }
  0x50   : > { %p1055_p9 = pnand %p1054_p7, %p1048_p1 }
  0x52   : > { %1058 = shalt.err (!%p1055_p9)
}
  0x53   : > { %s1059_s28 = scalar_lea.vmem %s1339_s16, 128  ;;  %s1150_s22 = smov [#allocation2]  }
  0x54   : > { %p1060_p12 = scmp.ne.s32.totalorder %s1339_s16, %s1059_s28  ;;  %s1064_s29 = sshll.u32 %s1150_s22, 4  ;;  %s1065_s29 = int_to_ptr.vmem [resolvable:$false] %s1064_s29 }
  0x55   : > { %s1066_s21 = scalar_lea.vmem %s1065_s29, 256  ;;  %p1067_p4 = scmp.lt.s32.totalorder %s1339_s16, %s1065_s29 }
  0x56   : > { %p1062_p2 = pnand %p1060_p12, %p1046_p0  ;;  %p1068_p13 = scmp.lt.s32.totalorder %s1066_s21, %s1059_s28 }
  0x58   : > { %p1063_p5 = pneg %p1062_p2  ;;  %p1069_p6 = por %p1068_p13, %p1067_p4 }
  0x5a   : > { %p1070_p10 = pnand %p1069_p6, %p1063_p5 }
  0x5c   : > { %1073 = shalt.err (!%p1070_p10)
}
  0x5d   : > { %919 = dma.hbm_to_vmem [thread:$0]  (!%p1341_p11), %s1337_s14, 128, %s1339_s16, %s309_s20  }
  0x5e   : > { %328 = sbr.rel (%p1244_p8) target bundleno = 669 (0x29d), region = 56  ;;  %s1373_s25 = sand.u32 (!%p1244_p8), 1, %s1136_s10  }
  0x5f   : > { %s807_s18 = sshll.u32 (!%p1244_p8), %s1373_s25, 3  ;;  %s331_s19 = scalar_lea.sflag (!%p1244_p8), [#allocation3], %s1373_s25 }
  0x60   : > { %s1379_s28 = scalar_lea.vmem (!%p1244_p8), [#allocation2], %s807_s18  ;;  %p1480_p4 = scmp.ne.s32.totalorder (!%p1244_p8), %s1472_s15, 0 }
  0x65   : > { %1119 = dma.done.wait (%p1480_p4), %s331_s19, 128  }
  0x66   : > { %1121 = vsyncadd (%p1480_p4), %s331_s19, 4294967168  ;;  %p1481_p5 = scmp.eq.s32.totalorder %s1225_s13, 0 }
  0x68   : > { %1123 = dma.done.wait (%p1481_p5), [#allocation6], 2048   ;;  %p1482_p8 = pmov %p1481_p5 }
  0x69   : > { %v1151_v0 = vmov 0.0   ;;  %vm1152_vm0 = vmmov 0   ;;  %v968_v1 = vld [vmem:[#allocation5] sm:$0xff]   ;;  %v969_v2 = vld [vmem:[#allocation5 + $0x8] sm:$0xff]   ;;  %v970_v3 = vld [vmem:[#allocation5 + $0x10] sm:$0xff]   ;;  %s836_s17 = sshll.u32 %s1225_s13, 7 }
  0x6a   : > { %1125 = vsyncadd (%p1482_p8), [#allocation6], 4294965248  ;;  %857 = vmatprep.subr.bf16.mxu0 %v1151_v0  ;;  %873 = vmatprep.mubr.msk.bf16.mxu0 %vm1152_vm0, %v1151_v0  ;;  %v971_v4 = vld [vmem:[#allocation5 + $0x18] sm:$0xff]   ;;  %v972_v5 = vld [vmem:[#allocation5 + $0x20] sm:$0xff]   ;;  %s376_s14 = scalar_lea.vmem [#allocation8], %s807_s18  ;;  %s1414_s22 = scalar_lea.hbm %s1467_s9, %s836_s17 }
  0x6b   : > { %877 = vmatprep.subr.bf16.mxu1 %v1151_v0  ;;  %893 = vmatprep.mubr.msk.bf16.mxu1 %vm1152_vm0, %v1151_v0  ;;  %v973_v6 = vld [vmem:[#allocation5 + $0x28] sm:$0xff]   ;;  %v974_v7 = vld [vmem:[#allocation5 + $0x30] sm:$0xff]   ;;  %v975_v8 = vld [vmem:[#allocation5 + $0x38] sm:$0xff]   ;;  %s710_s16 = sshll.u32 %s376_s14, 4  ;;  %s697_s29 = scalar_lea.sflag [#allocation4], %s1373_s25  ;;  %s1416_s16 = int_to_ptr.vmem [resolvable:$true] %s710_s16 }
  0x6c   : > { %858 = vmatpush3.bf16.msra.mxu0 %v968_v1  ;;  %v378_v9 = vld [vmem:[%s1379_s28] sm:$0xff]  ;;  %v976_v11 = vld [vmem:[#allocation7] sm:$0xff]   ;;  %v977_v12 = vld [vmem:[#allocation7 + $0x8] sm:$0xff]   ;;  %s1074_s21 = scalar_lea.vmem %s1416_s16, 128  ;;  %p1483_p0 = scmp.ne.s32.totalorder %s1478_s26, 0 }
  0x6d   : > { %859 = vmatprep.subr.bf16.mxu0 %v1151_v0  ;;  %v379_v10 = vpack.c.bf16 %v378_v9, %v378_v9  ;;  %878 = vmatpush3.bf16.msra.mxu1 %v976_v11  ;;  %v978_v13 = vld [vmem:[#allocation7 + $0x10] sm:$0xff]   ;;  %v979_v14 = vld [vmem:[#allocation7 + $0x18] sm:$0xff]   ;;  %v980_v15 = vld [vmem:[#allocation7 + $0x20] sm:$0xff]   ;;  %p1075_p11 = scmp.ne.s32.totalorder %s1416_s16, %s1074_s21  ;;  %s1153_s13 = smov [#allocation8]  }
  0x6e   : > { %879 = vmatprep.subr.bf16.mxu1 %v1151_v0  ;;  %v981_v16 = vld [vmem:[#allocation7 + $0x28] sm:$0xff]   ;;  %v982_v17 = vld [vmem:[#allocation7 + $0x30] sm:$0xff]   ;;  %v983_v18 = vld [vmem:[#allocation7 + $0x38] sm:$0xff]   ;;  %s1078_s18 = sshll.u32 %s1153_s13, 4  ;;  %s1079_s18 = int_to_ptr.vmem [resolvable:$false] %s1078_s18 }
  0x6f   : > { %v811_v19 = vld [vmem:[%s1460_s2] ss:$0 sm:$0xff]  ;;  %p1076_p1 = pnand %p1075_p11, %p1483_p0  ;;  %s1080_s19 = scalar_lea.vmem %s1079_s18, 256 }
  0x70   : > { %860 = vmatpush3.bf16.msra.mxu0 %v969_v2  ;;  %v821_v53 = vld [vmem:[%s1461_s3] ss:$0 sm:$0xff]  ;;  %p1081_p7 = scmp.lt.s32.totalorder %s1416_s16, %s1079_s18  ;;  %p1082_p9 = scmp.lt.s32.totalorder %s1080_s19, %s1074_s21 }
  0x71   : > { %861 = vmatprep.subr.bf16.mxu0 %v1151_v0  ;;  %880 = vmatpush3.bf16.msra.mxu1 %v977_v12  ;;  %v822_v55 = vld [vmem:[%s1462_s4] ss:$0 sm:$0xff]  ;;  %p1077_p3 = pneg %p1076_p1 }
  0x72   : > { %881 = vmatprep.subr.bf16.mxu1 %v1151_v0  ;;  %v823_v59 = vld [vmem:[%s1464_s6] ss:$0 sm:$0xff]  ;;  %p1083_p12 = por %p1082_p9, %p1081_p7 }
  0x74   : > { %862 = vmatpush3.bf16.msra.mxu0 %v970_v3  ;;  %p1084_p2 = pnand %p1083_p12, %p1077_p3 }
  0x75   : > { %863 = vmatprep.subr.bf16.mxu0 %v1151_v0  ;;  %882 = vmatpush3.bf16.msra.mxu1 %v978_v13 }
  0x76   : > { %883 = vmatprep.subr.bf16.mxu1 %v1151_v0 }
  0x78   : > { %864 = vmatpush3.bf16.msra.mxu0 %v971_v4 }
  0x79   : > { %865 = vmatprep.subr.bf16.mxu0 %v1151_v0  ;;  %884 = vmatpush3.bf16.msra.mxu1 %v979_v14 }
  0x7a   : > { %885 = vmatprep.subr.bf16.mxu1 %v1151_v0 }
  0x7c   : > { %866 = vmatpush3.bf16.msra.mxu0 %v972_v5 }
  0x7d   : > { %867 = vmatprep.subr.bf16.mxu0 %v1151_v0  ;;  %886 = vmatpush3.bf16.msra.mxu1 %v980_v15 }
  0x7e   : > { %887 = vmatprep.subr.bf16.mxu1 %v1151_v0 }
  0x80   : > { %868 = vmatpush3.bf16.msra.mxu0 %v973_v6 }
  0x81   : > { %869 = vmatprep.subr.bf16.mxu0 %v1151_v0  ;;  %888 = vmatpush3.bf16.msra.mxu1 %v981_v16 }
  0x82   : > { %889 = vmatprep.subr.bf16.mxu1 %v1151_v0 }
  0x84   : > { %870 = vmatpush3.bf16.msra.mxu0 %v974_v7 }
  0x85   : > { %871 = vmatprep.subr.bf16.mxu0 %v1151_v0  ;;  %890 = vmatpush3.bf16.msra.mxu1 %v982_v17 }
  0x86   : > { %891 = vmatprep.subr.bf16.mxu1 %v1151_v0 }
  0x88   : > { %872 = vmatpush3.bf16.msra.mxu0 %v975_v8 }
  0x89   : > { %892 = vmatpush3.bf16.msra.mxu1 %v983_v18 }
  0x8b   : > { %874 = vmatmul.mubr.bf16.vlgmr.msra.gmra.mrb[0].mxu0 %v379_v10 }
 0x15e   : > { %v485_v20 = vpop.f32.mrb[0].mxu0 }
 0x15f   : > { %v486_v21 = vadd.f32 %v811_v19, %v485_v20  ;;  %v875_v22 = vpop.f32.mrb[1].mxu0 }
 0x160   : > { %v488_v23 = vpop.f32.mrb[2].mxu0 }
 0x161   : > { %v492_v24 = vmul.f32 0.70710677, %v486_v21  ;;  %v876_v25 = vpop.f32.mrb[3].mxu0  ;;  %v491_v51 = vmul.f32 0.5, %v486_v21 }
 0x163   : > { %v820_v26 = vclamps-f32 %v492_v24, 4.0 }
 0x165   : > { %v495_v27 = vmul.f32 %v820_v26, %v820_v26 }
 0x167   : > { %v496_v28 = vmul.f32 -2.7261424e-10, %v495_v27  ;;  %v508_v29 = vmul.f32 -1.45660715e-05, %v495_v27 }
 0x169   : > { %v497_v30 = vadd.f32 2.7706815e-08, %v496_v28  ;;  %v509_v31 = vadd.f32 -0.00021337405, %v508_v29  ;;  %v833_v29 = vld [vmem:[%s1465_s7] ss:$0 sm:$0xff] }
 0x16b   : > { %v498_v32 = vmul.f32 %v497_v30, %v495_v27  ;;  %v510_v33 = vmul.f32 %v509_v31, %v495_v27  ;;  %v834_v31 = vld [vmem:[%s1466_s8] ss:$0 sm:$0xff] }
 0x16d   : > { %v499_v34 = vadd.f32 -2.101024e-06, %v498_v32  ;;  %v511_v35 = vadd.f32 -0.001682827, %v510_v33 }
 0x16f   : > { %v500_v36 = vmul.f32 %v499_v34, %v495_v27  ;;  %v512_v37 = vmul.f32 %v511_v35, %v495_v27 }
 0x171   : > { %v501_v38 = vadd.f32 -5.6925062e-05, %v500_v36  ;;  %v513_v39 = vadd.f32 -0.0073733293, %v512_v37 }
 0x173   : > { %v502_v40 = vmul.f32 %v501_v38, %v495_v27  ;;  %v514_v41 = vmul.f32 %v513_v39, %v495_v27 }
 0x175   : > { %v503_v42 = vadd.f32 -0.00073499064, %v502_v40  ;;  %v515_v43 = vadd.f32 -0.014264739, %v514_v41 }
 0x177   : > { %v504_v44 = vmul.f32 %v503_v42, %v495_v27  ;;  %984 = vrcp.f32 %v515_v43 }
 0x179   : > { %v505_v45 = vadd.f32 -0.0029546, %v504_v44 }
 0x17b   : > { %v506_v46 = vmul.f32 %v505_v45, %v495_v27 }
 0x17d   : > { %v507_v47 = vadd.f32 -0.016096033, %v506_v46 }
 0x17f   : > { %v516_v48 = vmul.f32 %v820_v26, %v507_v47 }
 0x181   : > { %v985_v49 = vpop.eup %984 }
 0x182   : > { %v518_v50 = vmul.f32 %v985_v49, %v516_v48 }
 0x184   : > { %v519_v52 = vadd.f32 1.0, %v518_v50 }
 0x186   : > { %v520_v54 = vmul.f32 %v519_v52, %v491_v51 }
 0x188   : > { %v528_v56 = vmul.f32 %v821_v53, %v520_v54 }
 0x18a   : > { %v536_v57 = vadd.f32 %v822_v55, %v528_v56 }
 0x18c   : > { %v537_v58 = vpack.c.bf16 %v536_v57, %v536_v57 }
 0x18e   : > { %894 = vmatmul.mubr.bf16.vlgmr.msra.gmra.mrb[0].mxu1 %v537_v58 }
 0x261   : > { %v643_v60 = vpop.f32.mrb[0].mxu1 }
 0x262   : > { %v644_v61 = vadd.f32 %v823_v59, %v643_v60  ;;  %v895_v62 = vpop.f32.mrb[1].mxu1 }
 0x263   : > { %v646_v63 = vpop.f32.mrb[2].mxu1 }
 0x264   : > { %v650_v0 = vmul.f32 0.70710677, %v644_v61  ;;  %v896_v1 = vpop.f32.mrb[3].mxu1  ;;  %v649_v27 = vmul.f32 0.5, %v644_v61 }
 0x266   : > { %v832_v2 = vclamps-f32 %v650_v0, 4.0 }
 0x268   : > { %v653_v3 = vmul.f32 %v832_v2, %v832_v2 }
 0x26a   : > { %v654_v4 = vmul.f32 -2.7261424e-10, %v653_v3  ;;  %v666_v5 = vmul.f32 -1.45660715e-05, %v653_v3 }
 0x26c   : > { %v655_v6 = vadd.f32 2.7706815e-08, %v654_v4  ;;  %v667_v7 = vadd.f32 -0.00021337405, %v666_v5 }
 0x26e   : > { %v656_v8 = vmul.f32 %v655_v6, %v653_v3  ;;  %v668_v9 = vmul.f32 %v667_v7, %v653_v3 }
 0x270   : > { %v657_v10 = vadd.f32 -2.101024e-06, %v656_v8  ;;  %v669_v11 = vadd.f32 -0.001682827, %v668_v9 }
 0x272   : > { %v658_v12 = vmul.f32 %v657_v10, %v653_v3  ;;  %v670_v13 = vmul.f32 %v669_v11, %v653_v3 }
 0x274   : > { %v659_v14 = vadd.f32 -5.6925062e-05, %v658_v12  ;;  %v671_v15 = vadd.f32 -0.0073733293, %v670_v13 }
 0x276   : > { %v660_v16 = vmul.f32 %v659_v14, %v653_v3  ;;  %v672_v17 = vmul.f32 %v671_v15, %v653_v3 }
 0x278   : > { %v661_v18 = vadd.f32 -0.00073499064, %v660_v16  ;;  %v673_v19 = vadd.f32 -0.014264739, %v672_v17 }
 0x27a   : > { %v662_v20 = vmul.f32 %v661_v18, %v653_v3  ;;  %986 = vrcp.f32 %v673_v19 }
 0x27c   : > { %v663_v21 = vadd.f32 -0.0029546, %v662_v20 }
 0x27e   : > { %v664_v22 = vmul.f32 %v663_v21, %v653_v3 }
 0x280   : > { %v665_v23 = vadd.f32 -0.016096033, %v664_v22 }
 0x282   : > { %v674_v24 = vmul.f32 %v832_v2, %v665_v23 }
 0x284   : > { %v987_v25 = vpop.eup %986 }
 0x285   : > { %v676_v26 = vmul.f32 %v987_v25, %v674_v24 }
 0x287   : > { %v677_v28 = vadd.f32 1.0, %v676_v26 }
 0x289   : > { %v678_v30 = vmul.f32 %v677_v28, %v649_v27 }
 0x28b   : > { %v686_v32 = vmul.f32 %v833_v29, %v678_v30 }
 0x28d   : > { %v694_v33 = vadd.f32 %v834_v31, %v686_v32 }
 0x28f   : > { %695 = vst [vmem:[%s376_s14] sm:$0xff] %v694_v33 }
 0x290   : > { %1087 = shalt.err (!%p1084_p2)
}
 0x291   : > { %s1088_s25 = scalar_lea.hbm %s1414_s22, 128  ;;  %s1092_s17 = scalar_lea.hbm %s1467_s9, 256 }
 0x292   : > { %p1089_p13 = scmp.ne.s32.totalorder %s1414_s22, %s1088_s25  ;;  %p1093_p4 = scmp.lt.u32.totalorder %s1414_s22, %s1467_s9 }
 0x293   : > { %p1094_p5 = scmp.lt.u32.totalorder %s1092_s17, %s1088_s25  ;;  %p1096_p11 = scmp.lt.u32.totalorder %s1088_s25, %s1414_s22 }
 0x294   : > { %p1090_p6 = pnand %p1089_p13, %p1483_p0 }
 0x295   : > { %p1095_p8 = por %p1094_p5, %p1093_p4 }
 0x296   : > { %p1091_p10 = pneg %p1090_p6 }
 0x297   : > { %p1097_p1 = por %p1096_p11, %p1095_p8 }
 0x299   : > { %p1098_p3 = pnand %p1097_p1, %p1091_p10 }
 0x29b   : > { %1101 = shalt.err (!%p1098_p3)
}
 0x29c   : > { %907 = dma.vmem_to_hbm [thread:$0]  (%p1483_p0), %s1416_s16, 128, %s1414_s22, %s697_s29  }
 0x29d PF: > { %s1484_s20 = sld [smem:[#allocation12_spill]]  ;;  %s722_s21 = sand.u32 1, %s1132_s30  }
 0x29e   : > { %p1486_p9 = scmp.ge.s32.totalorder %s1144_s12, 2  ;;  %s723_s13 = scalar_lea.sflag [#allocation4], %s722_s21 }
 0x2a3   : > { %p1485_p7 = scmp.ne.s32.totalorder %s1484_s20, 0 }
 0x2a5   : > { %p921_p12 = pnand %p1486_p9, %p1485_p7 }
 0x2a7   : > { %1127 = dma.done.wait (!%p921_p12), %s723_s13, 128  }
 0x2a8   : > { %1129 = vsyncadd (!%p921_p12), %s723_s13, 4294967168  ;;  %p23_p2 = scmp.ge.s32.totalorder %s1314_s24, 4   ;;  %s1487_s30 = smov %s1136_s10 }
 0x2a9   : > { %s1488_s10 = smov %s1140_s11  ;;  %s1489_s11 = smov %s1330_s27 }
 0x2aa   : > { %s1490_s12 = smov %s1314_s24  ;;  %25 = sbr.rel (!%p23_p2) target bundleno = 6 (0x6), region = 109 }
 0x2b1   :  { %728 = vsyncpa [#allocation3], 1 }
 0x2b2   :  { %730 = vsyncpa [#allocation3 + $0x1], 1 }
 0x2b3   :  { %731 = vsyncpa [#allocation6], 1 }
 0x2b4   :  { %732 = vsyncpa [#allocation4], 1 }
 0x2b5   :  { %734 = vsyncpa [#allocation4 + $0x1], 1 }

</bundles_post_ra>
